<compile_context>
chip_gen: v7x
topology: tpu7x:2x2x1
jax: 0.10.0
libtpu: 0.0.40
codegen_flags: <defaults>
</compile_context>

<pallas_src>
import jax
import jax.numpy as jnp
from jax.experimental import pallas as pl
from jax.experimental.pallas import tpu as pltpu

KH, KW = 3, 2   # Conv2d kernel_size=(3, 2), padding=1
PAD = 1
LANE = 128


def _round_up(x, m):
    return ((x + m - 1) // m) * m


# ---------------------------------------------------------------------------
# Fused kernel: conv-as-matmul + bias/ReLU + (folded concat) MLP, all in VMEM.
# Every tensor dimension seen here is a multiple of 128 lanes (zero padded at
# weight-prep time), so there are no masked partial-vreg loads/stores.
# ---------------------------------------------------------------------------
def fused_combined_kernel(x_ref, wc_ref, bc_ref, w1c_ref, w1m_ref, b1_ref,
                          w2_ref, b2_ref, o_ref):
    x = x_ref[...]                                                   # (bn, 128) bf16

    # Conv folded into a dense matmul; f32 accumulate, f32 bias, ReLU.
    conv = jnp.dot(x, wc_ref[...], preferred_element_type=jnp.float32)
    conv = jnp.maximum(conv + bc_ref[...], 0.0)                      # (bn, 128) f32

    # First Linear with the concat folded away:
    #   h = relu(conv_feat @ W1_conv + x_all @ W1_mlp(padded rows) + b1)
    h = jnp.dot(conv.astype(jnp.bfloat16), w1c_ref[...],
                preferred_element_type=jnp.float32)
    h = h + jnp.dot(x, w1m_ref[...], preferred_element_type=jnp.float32)
    h = jnp.maximum(h + b1_ref[...], 0.0)                            # (bn, 128) f32

    # Second Linear (output lane-padded to 128; wrapper slices to out_dim).
    out = jnp.dot(h.astype(jnp.bfloat16), w2_ref[...],
                  preferred_element_type=jnp.float32) + b2_ref[...]
    o_ref[...] = out.astype(o_ref.dtype)


# ---------------------------------------------------------------------------
# One-time weight preparation (host side, amortized):
#   - express Conv2d as a dense matrix on the flattened (C,H,W) input with
#     output columns in PyTorch Flatten order (C_out, Ho, Wo)
#   - split W1 into conv-feature rows and x_mlp rows (removes runtime concat)
#   - zero-pad every dim to a multiple of 128 lanes; cast weights to bf16
#     (biases stay f32: they add into f32 accumulators)
# ---------------------------------------------------------------------------
def _conv_as_dense_matrix(conv_w, H, W, pad=PAD):
    C_out, C_in, kh_sz, kw_sz = conv_w.shape
    Ho = H + 2 * pad - kh_sz + 1
    Wo = W + 2 * pad - kw_sz + 1

    y = jnp.arange(H)
    x = jnp.arange(W)
    h = jnp.arange(Ho)
    w = jnp.arange(Wo)

    kh = y[:, None] - h[None, :] + pad            # (H, Ho)
    kw = x[:, None] - w[None, :] + pad            # (W, Wo)
    kh_valid = (kh >= 0) & (kh < kh_sz)
    kw_valid = (kw >= 0) & (kw < kw_sz)
    kh_c = jnp.clip(kh, 0, kh_sz - 1)
    kw_c = jnp.clip(kw, 0, kw_sz - 1)

    # conv_w[co, ci, kh_c[y,h], kw_c[x,w]] -> (C_out, C_in, H, Ho, W, Wo)
    wsel = conv_w[:, :, kh_c][:, :, :, :, kw_c]
    mask = (kh_valid[:, :, None, None] & kw_valid[None, None, :, :]).astype(conv_w.dtype)
    wsel = wsel * mask[None, None]

    # rows: flattened (C_in, H, W) input;  cols: flattened (C_out, Ho, Wo) output
    w_big = wsel.transpose(1, 2, 4, 0, 3, 5).reshape(C_in * H * W, C_out * Ho * Wo)
    return w_big, Ho, Wo


def prepare_params(params, C_in, H, W):
    conv_w, conv_b, w1, b1, w2, b2 = params
    C_out = conv_w.shape[0]
    w_conv_dense, Ho, Wo = _conv_as_dense_matrix(conv_w, H, W)   # (C_in*H*W, C_out*Ho*Wo)

    cnn_feat = C_out * Ho * Wo
    k_cnn = C_in * H * W
    f_mlp = w1.shape[0] - cnn_feat
    hidden = w1.shape[1]
    out_dim = w2.shape[1]

    K_IN   = _round_up(k_cnn + f_mlp, LANE)   # packed activation width
    F_CONV = _round_up(cnn_feat, LANE)        # conv feature width
    HID    = _round_up(hidden, LANE)          # hidden width
    OUT    = _round_up(out_dim, LANE)         # output width

    wc  = jnp.zeros((K_IN, F_CONV), jnp.float32).at[:k_cnn, :cnn_feat].set(w_conv_dense)
    bc  = jnp.zeros((1, F_CONV), jnp.float32).at[0, :cnn_feat].set(jnp.repeat(conv_b, Ho * Wo))
    w1c = jnp.zeros((F_CONV, HID), jnp.float32).at[:cnn_feat, :hidden].set(w1[:cnn_feat])
    w1m = jnp.zeros((K_IN, HID), jnp.float32).at[k_cnn:k_cnn + f_mlp, :hidden].set(w1[cnn_feat:])
    b1r = jnp.zeros((1, HID), jnp.float32).at[0, :hidden].set(b1)
    w2p = jnp.zeros((HID, OUT), jnp.float32).at[:hidden, :out_dim].set(w2)
    b2r = jnp.zeros((1, OUT), jnp.float32).at[0, :out_dim].set(b2)

    prepped = (wc.astype(jnp.bfloat16), bc,
               w1c.astype(jnp.bfloat16), w1m.astype(jnp.bfloat16), b1r,
               w2p.astype(jnp.bfloat16), b2r)
    meta = dict(k_cnn=k_cnn, f_mlp=f_mlp, K_IN=K_IN, F_CONV=F_CONV,
                HID=HID, OUT=OUT, out_dim=out_dim)
    return prepped, meta


# ---------------------------------------------------------------------------
# Forward pass.
# ---------------------------------------------------------------------------
def _pick_block_rows(N):
    # ~2 big parallel blocks so v7x's two TensorCores both get work; on
    # v5e/v6e (1 TC) that's just 2 cheap serial steps.  MXU-height aligned
    # (256, also a multiple of v5e's 128) and capped so buffers stay MiB-scale
    # even under v5e's 16 MiB scoped-VMEM default.
    bn = _round_up(pl.cdiv(N, 2), 256)
    return min(bn, 2048)


def combined_nn_forward(x_cnn, x_mlp, prepped, meta):
    wc, bc, w1c, w1m, b1r, w2p, b2r = prepped
    N = x_cnn.shape[0]
    K_IN, F_CONV, HID, OUT = meta["K_IN"], meta["F_CONV"], meta["HID"], meta["OUT"]
    out_dim = meta["out_dim"]
    k_all = meta["k_cnn"] + meta["f_mlp"]

    # One lane-dense activation stream: [flatten(x_cnn) | x_mlp | zeros] in bf16.
    x_all = jnp.concatenate([x_cnn.reshape(N, -1), x_mlp], axis=1)
    if K_IN > k_all:
        x_all = jnp.pad(x_all, ((0, 0), (0, K_IN - k_all)))
    x_all = x_all.astype(jnp.bfloat16)

    weights = (wc, bc, w1c, w1m, b1r, w2p, b2r)
    flops = 2 * N * (K_IN * F_CONV + F_CONV * HID + K_IN * HID + HID * OUT)
    bytes_accessed = (int(x_all.size) * 2 + N * OUT * 4
                      + sum(int(w.size) * w.dtype.itemsize for w in weights))
    cost = pl.CostEstimate(flops=flops, transcendentals=0,
                           bytes_accessed=bytes_accessed)

    bn = _pick_block_rows(N)
    if N <= bn:
        # Tiny batch: no grid, no pipelining -- everything sits in VMEM once.
        out_full = pl.pallas_call(
            fused_combined_kernel,
            out_shape=jax.ShapeDtypeStruct((N, OUT), jnp.float32),
            in_specs=[pl.BlockSpec(memory_space=pltpu.MemorySpace.VMEM)] * 8,
            out_specs=pl.BlockSpec(memory_space=pltpu.MemorySpace.VMEM),
            cost_estimate=cost,
        )(x_all, *weights)
    else:
        # Large batch: big MXU-aligned row blocks, weights resident across steps.
        grid = (pl.cdiv(N, bn),)
        full = lambda arr: pl.BlockSpec(arr.shape, lambda i: (0, 0))
        out_full = pl.pallas_call(
            fused_combined_kernel,
            out_shape=jax.ShapeDtypeStruct((N, OUT), jnp.float32),
            grid=grid,
            in_specs=[pl.BlockSpec((bn, K_IN), lambda i: (i, 0))]
                     + [full(w) for w in weights],
            out_specs=pl.BlockSpec((bn, OUT), lambda i: (i, 0)),
            compiler_params=pltpu.CompilerParams(
                dimension_semantics=("parallel",)),
            cost_estimate=cost,
        )(x_all, *weights)

    return out_full[:, :out_dim]


# ---------------------------------------------------------------------------
# Reference (pure JAX) for a sanity check.
# ---------------------------------------------------------------------------
def combined_nn_reference(x_cnn, x_mlp, params):
    conv_w, conv_b, w1, b1, w2, b2 = params
    y = jax.lax.conv_general_dilated(
        x_cnn, conv_w, window_strides=(1, 1), padding=((PAD, PAD), (PAD, PAD)),
        dimension_numbers=("NCHW", "OIHW", "NCHW"))
    y = jnp.maximum(y + conv_b[None, :, None, None], 0.0)
    y = y.reshape(y.shape[0], -1)
    combined = jnp.concatenate([y, x_mlp], axis=1)
    h = jnp.maximum(combined @ w1 + b1, 0.0)
    return h @ w2 + b2


# ---------------------------------------------------------------------------
if __name__ == "__main__":
    # Shapes must satisfy H_out*W_out == mlp_input_features // 2:
    #   H=4, W=3 -> Ho*Wo = 4*4 = 16 = 32 // 2
    N = 2
    cnn_input_channels = 4
    cnn_output_channels = 8
    H, W = 4, 3
    mlp_input_features = 32
    mlp_hidden_dim = 32
    output_dim = 16
    cnn_output_size = cnn_output_channels * (mlp_input_features // 2)  # 8 * 16 = 128

    key = jax.random.PRNGKey(0)
    keys = jax.random.split(key, 8)

    x_cnn = jax.random.normal(keys[0], (N, cnn_input_channels, H, W), jnp.float32)
    x_mlp = jax.random.normal(keys[1], (N, mlp_input_features), jnp.float32)

    conv_w = 0.1 * jax.random.normal(
        keys[2], (cnn_output_channels, cnn_input_channels, KH, KW), jnp.float32)
    conv_b = 0.1 * jax.random.normal(keys[3], (cnn_output_channels,), jnp.float32)
    w1 = 0.05 * jax.random.normal(
        keys[4], (mlp_input_features + cnn_output_size, mlp_hidden_dim), jnp.float32)
    b1 = 0.05 * jax.random.normal(keys[5], (mlp_hidden_dim,), jnp.float32)
    w2 = 0.05 * jax.random.normal(keys[6], (mlp_hidden_dim, output_dim), jnp.float32)
    b2 = 0.05 * jax.random.normal(keys[7], (output_dim,), jnp.float32)

    params = (conv_w, conv_b, w1, b1, w2, b2)

    # One-time weight prep (fold conv to dense matrix, split W1, pad to 128, bf16).
    prepped, meta = prepare_params(params, cnn_input_channels, H, W)
    prepped = jax.tree.map(jax.block_until_ready, prepped)

    # --- Small-batch path (no grid) -----------------------------------------
    out = jax.block_until_ready(combined_nn_forward(x_cnn, x_mlp, prepped, meta))
    ref = combined_nn_reference(x_cnn, x_mlp, params)
    assert out.shape == (N, output_dim)
    assert jnp.allclose(out, ref, atol=2e-2, rtol=2e-2)

    # --- Large-batch path (grid of MXU-aligned row blocks) -------------------
    Nb = 512   # bn=256 -> 2 parallel blocks (feeds both v7x TensorCores)
    xk = jax.random.split(jax.random.PRNGKey(1), 2)
    x_cnn_b = jax.random.normal(xk[0], (Nb, cnn_input_channels, H, W), jnp.float32)
    x_mlp_b = jax.random.normal(xk[1], (Nb, mlp_input_features), jnp.float32)
    out_b = jax.block_until_ready(combined_nn_forward(x_cnn_b, x_mlp_b, prepped, meta))
    ref_b = combined_nn_reference(x_cnn_b, x_mlp_b, params)
    assert out_b.shape == (Nb, output_dim)
    assert jnp.allclose(out_b, ref_b, atol=2e-2, rtol=2e-2)

    print("KERNEL_OK")
</pallas_src>

<mosaic_0001>
module attributes {stable_mosaic.version = 11 : i64} {
  func.func @fused_combined_kernel(%arg0: memref<2x128xbf16, #tpu.memory_space<vmem>>, %arg1: memref<128x128xbf16, #tpu.memory_space<vmem>>, %arg2: memref<1x128xf32, #tpu.memory_space<vmem>>, %arg3: memref<128x128xbf16, #tpu.memory_space<vmem>>, %arg4: memref<128x128xbf16, #tpu.memory_space<vmem>>, %arg5: memref<1x128xf32, #tpu.memory_space<vmem>>, %arg6: memref<128x128xbf16, #tpu.memory_space<vmem>>, %arg7: memref<1x128xf32, #tpu.memory_space<vmem>>, %arg8: memref<2x128xf32, #tpu.memory_space<vmem>>) attributes {dimension_semantics = [], scalar_prefetch = 0 : i64, scratch_operands = 0 : i64, tpu.core_type = #tpu.core_type<tc>} {
    %c0 = arith.constant 0 : index
    %c0_0 = arith.constant 0 : index
    %0 = vector.load %arg0[%c0, %c0_0] : memref<2x128xbf16, #tpu.memory_space<vmem>>, vector<2x128xbf16>
    %c0_1 = arith.constant 0 : index
    %c0_2 = arith.constant 0 : index
    %1 = vector.load %arg1[%c0_1, %c0_2] : memref<128x128xbf16, #tpu.memory_space<vmem>>, vector<128x128xbf16>
    %cst = arith.constant dense<0.000000e+00> : vector<2x128xf32>
    %2 = tpu.matmul %0, %1, %cst {dimension_numbers = #tpu.dot_dimension_numbers<[1], [0], [0], [1], [0, 0, 1, 1], [], []>} : vector<2x128xbf16>, vector<128x128xbf16>, vector<2x128xf32> -> vector<2x128xf32>
    %c0_3 = arith.constant 0 : index
    %c0_4 = arith.constant 0 : index
    %3 = vector.load %arg2[%c0_3, %c0_4] : memref<1x128xf32, #tpu.memory_space<vmem>>, vector<1x128xf32>
    %4 = vector.broadcast %3 : vector<1x128xf32> to vector<2x128xf32>
    %5 = arith.addf %2, %4 : vector<2x128xf32>
    %cst_5 = arith.constant 0.000000e+00 : f32
    %6 = vector.broadcast %cst_5 : f32 to vector<2x128xf32>
    %7 = arith.maximumf %5, %6 : vector<2x128xf32>
    %8 = arith.truncf %7 : vector<2x128xf32> to vector<2x128xbf16>
    %c0_6 = arith.constant 0 : index
    %c0_7 = arith.constant 0 : index
    %9 = vector.load %arg3[%c0_6, %c0_7] : memref<128x128xbf16, #tpu.memory_space<vmem>>, vector<128x128xbf16>
    %cst_8 = arith.constant dense<0.000000e+00> : vector<2x128xf32>
    %10 = tpu.matmul %8, %9, %cst_8 {dimension_numbers = #tpu.dot_dimension_numbers<[1], [0], [0], [1], [0, 0, 1, 1], [], []>} : vector<2x128xbf16>, vector<128x128xbf16>, vector<2x128xf32> -> vector<2x128xf32>
    %c0_9 = arith.constant 0 : index
    %c0_10 = arith.constant 0 : index
    %11 = vector.load %arg4[%c0_9, %c0_10] : memref<128x128xbf16, #tpu.memory_space<vmem>>, vector<128x128xbf16>
    %cst_11 = arith.constant dense<0.000000e+00> : vector<2x128xf32>
    %12 = tpu.matmul %0, %11, %cst_11 {dimension_numbers = #tpu.dot_dimension_numbers<[1], [0], [0], [1], [0, 0, 1, 1], [], []>} : vector<2x128xbf16>, vector<128x128xbf16>, vector<2x128xf32> -> vector<2x128xf32>
    %13 = arith.addf %10, %12 : vector<2x128xf32>
    %c0_12 = arith.constant 0 : index
    %c0_13 = arith.constant 0 : index
    %14 = vector.load %arg5[%c0_12, %c0_13] : memref<1x128xf32, #tpu.memory_space<vmem>>, vector<1x128xf32>
    %15 = vector.broadcast %14 : vector<1x128xf32> to vector<2x128xf32>
    %16 = arith.addf %13, %15 : vector<2x128xf32>
    %cst_14 = arith.constant 0.000000e+00 : f32
    %17 = vector.broadcast %cst_14 : f32 to vector<2x128xf32>
    %18 = arith.maximumf %16, %17 : vector<2x128xf32>
    %19 = arith.truncf %18 : vector<2x128xf32> to vector<2x128xbf16>
    %c0_15 = arith.constant 0 : index
    %c0_16 = arith.constant 0 : index
    %20 = vector.load %arg6[%c0_15, %c0_16] : memref<128x128xbf16, #tpu.memory_space<vmem>>, vector<128x128xbf16>
    %cst_17 = arith.constant dense<0.000000e+00> : vector<2x128xf32>
    %21 = tpu.matmul %19, %20, %cst_17 {dimension_numbers = #tpu.dot_dimension_numbers<[1], [0], [0], [1], [0, 0, 1, 1], [], []>} : vector<2x128xbf16>, vector<128x128xbf16>, vector<2x128xf32> -> vector<2x128xf32>
    %c0_18 = arith.constant 0 : index
    %c0_19 = arith.constant 0 : index
    %22 = vector.load %arg7[%c0_18, %c0_19] : memref<1x128xf32, #tpu.memory_space<vmem>>, vector<1x128xf32>
    %23 = vector.broadcast %22 : vector<1x128xf32> to vector<2x128xf32>
    %24 = arith.addf %21, %23 : vector<2x128xf32>
    %c0_20 = arith.constant 0 : index
    %c0_21 = arith.constant 0 : index
    %25 = vector.load %arg8[%c0_20, %c0_21] : memref<2x128xf32, #tpu.memory_space<vmem>>, vector<2x128xf32>
    tpu.vector_store %arg8[%c0_20, %c0_21], %24 {strides = array<i32>} : memref<2x128xf32, #tpu.memory_space<vmem>>, vector<2x128xf32>,
    return
  }
}

</mosaic_0001>

<bundles_post_ra>
// kernel: tpu_custom_call.1
= control target key start
LH: loop header
LB: loop body
LE: loop exit
PB: predicated region body
PF: predicated region fallthrough
CT: control target
= control target key end

     0   :  { %13 = vsyncpa [#allocation3], 0  ;;  %s1079_s0 = inlined_call_operand.hbm [shape: bf16[2,128], index: 0, kind: input, shape index: {}]   ;;  %s1080_s1 = inlined_call_operand.hbm [shape: bf16[128,128], index: 1, kind: input, shape index: {}]   ;;  %s1081_s2 = inlined_call_operand.vmem [shape: f32[1,128], index: 2, kind: input, shape index: {}]   ;;  %s1082_s3 = inlined_call_operand.hbm [shape: bf16[128,128], index: 3, kind: input, shape index: {}]   ;;  %s1083_s4 = inlined_call_operand.hbm [shape: bf16[128,128], index: 4, kind: input, shape index: {}]   ;;  %s1084_s5 = inlined_call_operand.vmem [shape: f32[1,128], index: 5, kind: input, shape index: {}]   ;;  %s1085_s6 = inlined_call_operand.hbm [shape: bf16[128,128], index: 6, kind: input, shape index: {}]   ;;  %s1086_s7 = inlined_call_operand.vmem [shape: f32[1,128], index: 7, kind: input, shape index: {}]   ;;  %s1087_s8 = inlined_call_operand.hbm [shape: f32[2,128], index: 8, kind: output, shape index: {}]  }
   0x1   :  { %14 = vsyncpa [#allocation6], 0 }
   0x2   :  { %15 = vsyncpa [#allocation9], 0 }
   0x3   :  { %16 = vsyncpa [#allocation4], 0  ;;  %s891_s27 = smov [#allocation5]   ;;  %s751_s9 = scalar_lea.hbm %s1080_s1, 1024 }
   0x4   :  { %s32_s28 = sshll.u32 %s891_s27, 4  ;;  %p752_p0 = scmp.ne.s32.totalorder %s1080_s1, %s751_s9  ;;  %s33_s28 = int_to_ptr.vmem [resolvable:$true] %s32_s28 }
   0x5   :  { %p755_p1 = scmp.lt.u32.totalorder %s751_s9, %s1080_s1 }
   0x7   :  { %p757_p2 = pnand %p755_p1, %p752_p0 }
   0x9   :  { %760 = shalt.err (!%p757_p2)
}
   0xa   :  { %s761_s14 = scalar_lea.vmem %s33_s28, 1024  ;;  %p766_p4 = scmp.lt.s32.totalorder %s33_s28, %s33_s28 }
   0xb   :  { %p762_p3 = scmp.ne.s32.totalorder %s33_s28, %s761_s14  ;;  %p767_p5 = scmp.lt.s32.totalorder %s761_s14, %s761_s14 }
   0xd   :  { %p768_p6 = por %p767_p5, %p766_p4 }
   0xf   :  { %p769_p7 = pnand %p768_p6, %p762_p3 }
  0x11   :  { %772 = shalt.err (!%p769_p7)
}
  0x12   :  { %s892_s15 = smov 64   ;;  %s893_s16 = smov 4  }
  0x13   :  { %38 = dma.hbm_to_vmem [thread:$0]  %s1080_s1, 1024, %s33_s28, [#allocation6], %s892_s15, %s892_s15, %s893_s16  }
  0x14   :  { %s894_s19 = smov [#allocation8]   ;;  %s895_s21 = smov [#allocation2]  }
  0x15   :  { %s58_s20 = sshll.u32 %s894_s19, 4  ;;  %s23_s22 = sshll.u32 %s895_s21, 4  ;;  %s59_s20 = int_to_ptr.vmem [resolvable:$true] %s58_s20  ;;  %s24_s22 = int_to_ptr.vmem [resolvable:$true] %s23_s22 }
  0x16   :  { %s773_s25 = scalar_lea.hbm %s1083_s4, 1024 }
  0x17   :  { %p774_p8 = scmp.ne.s32.totalorder %s1083_s4, %s773_s25  ;;  %p777_p9 = scmp.lt.u32.totalorder %s773_s25, %s1083_s4 }
  0x19   :  { %p779_p10 = pnand %p777_p9, %p774_p8 }
  0x1b   :  { %782 = shalt.err (!%p779_p10)
}
  0x1c   :  { %s783_s1 = scalar_lea.vmem %s59_s20, 1024  ;;  %p788_p12 = scmp.lt.s32.totalorder %s59_s20, %s59_s20 }
  0x1d   :  { %p784_p11 = scmp.ne.s32.totalorder %s59_s20, %s783_s1  ;;  %p789_p13 = scmp.lt.s32.totalorder %s783_s1, %s783_s1 }
  0x1f   :  { %p790_p0 = por %p789_p13, %p788_p12 }
  0x21   :  { %p791_p1 = pnand %p790_p0, %p784_p11 }
  0x23   :  { %794 = shalt.err (!%p791_p1)
}
  0x24   :  { %64 = dma.hbm_to_vmem [thread:$0]  %s1083_s4, 1024, %s59_s20, [#allocation9], %s892_s15, %s892_s15, %s893_s16  }
  0x25   :  { %s795_s12 = scalar_lea.hbm %s1079_s0, 16 }
  0x26   :  { %p796_p2 = scmp.ne.s32.totalorder %s1079_s0, %s795_s12  ;;  %p799_p3 = scmp.lt.u32.totalorder %s795_s12, %s1079_s0 }
  0x28   :  { %p801_p4 = pnand %p799_p3, %p796_p2 }
  0x2a   :  { %804 = shalt.err (!%p801_p4)
}
  0x2b   :  { %s805_s19 = scalar_lea.vmem %s24_s22, 16  ;;  %s809_s21 = scalar_lea.vmem %s24_s22, 32 }
  0x2c   :  { %p806_p5 = scmp.ne.s32.totalorder %s24_s22, %s805_s19  ;;  %p810_p6 = scmp.lt.s32.totalorder %s24_s22, %s24_s22 }
  0x2d   :  { %p811_p7 = scmp.lt.s32.totalorder %s809_s21, %s805_s19 }
  0x2f   :  { %p812_p8 = por %p811_p7, %p810_p6 }
  0x31   :  { %p813_p9 = pnand %p812_p8, %p806_p5 }
  0x33   :  { %816 = shalt.err (!%p813_p9)
}
  0x34   :  { %26 = dma.hbm_to_vmem [thread:$0]  %s1079_s0, 16, %s24_s22, [#allocation3]  }
  0x35   :  { %s896_s23 = smov [#allocation7]   ;;  %s897_s25 = smov [#allocation10]  }
  0x36   :  { %s46_s24 = sshll.u32 %s896_s23, 4  ;;  %s72_s26 = sshll.u32 %s897_s25, 4  ;;  %s47_s24 = int_to_ptr.vmem [resolvable:$true] %s46_s24  ;;  %s73_s26 = int_to_ptr.vmem [resolvable:$true] %s72_s26 }
  0x37   :  { %s817_s30 = scalar_lea.hbm %s1082_s3, 1024 }
  0x38   :  { %p818_p10 = scmp.ne.s32.totalorder %s1082_s3, %s817_s30  ;;  %p821_p11 = scmp.lt.u32.totalorder %s817_s30, %s1082_s3 }
  0x3a   :  { %p823_p12 = pnand %p821_p11, %p818_p10 }
  0x3c   :  { %826 = shalt.err (!%p823_p12)
}
  0x3d   :  { %s827_s0 = scalar_lea.vmem %s47_s24, 1024  ;;  %p832_p0 = scmp.lt.s32.totalorder %s47_s24, %s47_s24 }
  0x3e   :  { %p828_p13 = scmp.ne.s32.totalorder %s47_s24, %s827_s0  ;;  %p833_p1 = scmp.lt.s32.totalorder %s827_s0, %s827_s0 }
  0x40   :  { %p834_p2 = por %p833_p1, %p832_p0 }
  0x42   :  { %p835_p3 = pnand %p834_p2, %p828_p13 }
  0x44   :  { %838 = shalt.err (!%p835_p3)
}
  0x45   :  { %52 = dma.hbm_to_vmem [thread:$0]  %s1082_s3, 1024, %s47_s24, [#allocation6], %s892_s15, %s892_s15, %s893_s16  }
  0x46   :  { %s839_s14 = scalar_lea.hbm %s1085_s6, 1024 }
  0x47   :  { %p840_p4 = scmp.ne.s32.totalorder %s1085_s6, %s839_s14  ;;  %p843_p5 = scmp.lt.u32.totalorder %s839_s14, %s1085_s6 }
  0x49   :  { %p845_p6 = pnand %p843_p5, %p840_p4 }
  0x4b   :  { %848 = shalt.err (!%p845_p6)
}
  0x4c   :  { %s849_s4 = scalar_lea.vmem %s73_s26, 1024  ;;  %p854_p8 = scmp.lt.s32.totalorder %s73_s26, %s73_s26 }
  0x4d   :  { %p850_p7 = scmp.ne.s32.totalorder %s73_s26, %s849_s4  ;;  %p855_p9 = scmp.lt.s32.totalorder %s849_s4, %s849_s4 }
  0x4f   :  { %p856_p10 = por %p855_p9, %p854_p8 }
  0x51   :  { %p857_p11 = pnand %p856_p10, %p850_p7 }
  0x53   :  { %860 = shalt.err (!%p857_p11)
}
  0x54   :  { %78 = dma.hbm_to_vmem [thread:$0]  %s1085_s6, 1024, %s73_s26, [#allocation9], %s892_s15, %s892_s15, %s893_s16  }
  0x55   :  { %883 = dma.done.wait [#allocation3], 16  }
  0x56   :  { %884 = vsyncadd [#allocation3], 4294967280 }
  0x57   :  { %885 = dma.done.wait [#allocation6], 2048  }
  0x58   :  { %886 = vsyncadd [#allocation6], 4294965248 }
  0x59   :  { %887 = dma.done.wait [#allocation9], 2048  }
  0x5a   :  { %888 = vsyncadd [#allocation9], 4294965248  ;;  %v898_v0 = vmov 0.0   ;;  %vm899_vm0 = vmmov 0   ;;  %v719_v1 = vld [vmem:[#allocation5] sm:$0xff]   ;;  %v720_v2 = vld [vmem:[#allocation5 + $0x8] sm:$0xff]  }
  0x5b   :  { %629 = vmatprep.subr.bf16.mxu0 %v898_v0  ;;  %645 = vmatprep.mubr.msk.bf16.mxu0 %vm899_vm0, %v898_v0  ;;  %v721_v3 = vld [vmem:[#allocation5 + $0x10] sm:$0xff]   ;;  %v727_v4 = vld [vmem:[#allocation8] sm:$0xff]   ;;  %v722_v5 = vld [vmem:[#allocation5 + $0x18] sm:$0xff]   ;;  %s900_s25 = smov [#allocation11]  }
  0x5c   :  { %649 = vmatprep.subr.bf16.mxu1 %v898_v0  ;;  %665 = vmatprep.mubr.msk.bf16.mxu1 %vm899_vm0, %v898_v0  ;;  %v729_v6 = vld [vmem:[#allocation8 + $0x8] sm:$0xff]   ;;  %v723_v7 = vld [vmem:[#allocation5 + $0x20] sm:$0xff]   ;;  %v731_v8 = vld [vmem:[#allocation8 + $0x10] sm:$0xff]   ;;  %s547_s26 = sshll.u32 %s900_s25, 4  ;;  %s548_s26 = int_to_ptr.vmem [resolvable:$true] %s547_s26 }
  0x5d   :  { %630 = vmatpush3.bf16.msra.mxu0 %v719_v1  ;;  %650 = vmatpush3.bf16.msra.mxu1 %v727_v4  ;;  %v724_v9 = vld [vmem:[#allocation5 + $0x28] sm:$0xff]   ;;  %v733_v10 = vld [vmem:[#allocation8 + $0x18] sm:$0xff]   ;;  %v725_v11 = vld [vmem:[#allocation5 + $0x30] sm:$0xff]   ;;  %p866_p13 = scmp.lt.s32.totalorder %s548_s26, %s548_s26 }
  0x5e   :  { %631 = vmatprep.subr.bf16.mxu0 %v898_v0  ;;  %651 = vmatprep.subr.bf16.mxu1 %v898_v0  ;;  %v735_v12 = vld [vmem:[#allocation8 + $0x20] sm:$0xff]   ;;  %v726_v13 = vld [vmem:[#allocation5 + $0x38] sm:$0xff]   ;;  %v737_v14 = vld [vmem:[#allocation8 + $0x28] sm:$0xff]  }
  0x5f   :  { %v97_v15 = vld [vmem:[#allocation2] sm:$0x1]  ;;  %v728_v16 = vld [vmem:[#allocation7] sm:$0xff]   ;;  %v739_v17 = vld [vmem:[#allocation8 + $0x30] sm:$0xff]  }
  0x60   :  { %v730_v18 = vld [vmem:[#allocation7 + $0x8] sm:$0xff]   ;;  %v732_v19 = vld [vmem:[#allocation7 + $0x10] sm:$0xff]   ;;  %v734_v20 = vld [vmem:[#allocation7 + $0x18] sm:$0xff]  }
  0x61   :  { %632 = vmatpush3.bf16.msra.mxu0 %v720_v2  ;;  %652 = vmatpush3.bf16.msra.mxu1 %v729_v6  ;;  %v736_v21 = vld [vmem:[#allocation7 + $0x20] sm:$0xff]   ;;  %v738_v22 = vld [vmem:[#allocation7 + $0x28] sm:$0xff]   ;;  %v740_v23 = vld [vmem:[#allocation7 + $0x30] sm:$0xff]  }
  0x62   :  { %633 = vmatprep.subr.bf16.mxu0 %v898_v0  ;;  %653 = vmatprep.subr.bf16.mxu1 %v898_v0  ;;  %v741_v24 = vld [vmem:[#allocation8 + $0x38] sm:$0xff]   ;;  %v743_v26 = vld [vmem:[#allocation10] sm:$0xff]   ;;  %v744_v27 = vld [vmem:[#allocation10 + $0x8] sm:$0xff]  }
  0x63   :  { %v742_v25 = vld [vmem:[#allocation7 + $0x38] sm:$0xff]   ;;  %v745_v28 = vld [vmem:[#allocation10 + $0x10] sm:$0xff]   ;;  %v747_v30 = vld [vmem:[#allocation10 + $0x20] sm:$0xff]  }
  0x64   :  { %v746_v29 = vld [vmem:[#allocation10 + $0x18] sm:$0xff]   ;;  %v748_v31 = vld [vmem:[#allocation10 + $0x28] sm:$0xff]   ;;  %v749_v44 = vld [vmem:[#allocation10 + $0x30] sm:$0xff]  }
  0x65   :  { %634 = vmatpush3.bf16.msra.mxu0 %v721_v3  ;;  %654 = vmatpush3.bf16.msra.mxu1 %v731_v8  ;;  %v558_v32 = vld [vmem:[%s1081_s2] ss:$0 sm:$0xff] }
  0x66   :  { %635 = vmatprep.subr.bf16.mxu0 %v898_v0  ;;  %655 = vmatprep.subr.bf16.mxu1 %v898_v0  ;;  %v750_v45 = vld [vmem:[#allocation10 + $0x38] sm:$0xff]  }
  0x67   :  { %v583_v47 = vld [vmem:[%s1084_s5] ss:$0 sm:$0xff]  ;;  %s861_s5 = scalar_lea.vmem %s548_s26, 32 }
  0x68   :  { %v584_v55 = vld [vmem:[%s1086_s7] ss:$0 sm:$0xff]  ;;  %p862_p12 = scmp.ne.s32.totalorder %s548_s26, %s861_s5  ;;  %p867_p0 = scmp.lt.s32.totalorder %s861_s5, %s861_s5 }
  0x69   :  { %636 = vmatpush3.bf16.msra.mxu0 %v722_v5  ;;  %656 = vmatpush3.bf16.msra.mxu1 %v733_v10 }
  0x6a   :  { %637 = vmatprep.subr.bf16.mxu0 %v898_v0  ;;  %657 = vmatprep.subr.bf16.mxu1 %v898_v0  ;;  %p868_p1 = por %p867_p0, %p866_p13 }
  0x6c   :  { %p869_p2 = pnand %p868_p1, %p862_p12 }
  0x6d   :  { %638 = vmatpush3.bf16.msra.mxu0 %v723_v7  ;;  %658 = vmatpush3.bf16.msra.mxu1 %v735_v12 }
  0x6e   :  { %639 = vmatprep.subr.bf16.mxu0 %v898_v0  ;;  %659 = vmatprep.subr.bf16.mxu1 %v898_v0 }
  0x71   :  { %640 = vmatpush3.bf16.msra.mxu0 %v724_v9  ;;  %660 = vmatpush3.bf16.msra.mxu1 %v737_v14 }
  0x72   :  { %641 = vmatprep.subr.bf16.mxu0 %v898_v0  ;;  %661 = vmatprep.subr.bf16.mxu1 %v898_v0 }
  0x75   :  { %642 = vmatpush3.bf16.msra.mxu0 %v725_v11  ;;  %662 = vmatpush3.bf16.msra.mxu1 %v739_v17 }
  0x76   :  { %643 = vmatprep.subr.bf16.mxu0 %v898_v0  ;;  %663 = vmatprep.subr.bf16.mxu1 %v898_v0 }
  0x79   :  { %644 = vmatpush3.bf16.msra.mxu0 %v726_v13  ;;  %664 = vmatpush3.bf16.msra.mxu1 %v741_v24 }
  0x7a   :  { %669 = vmatprep.subr.bf16.mxu0 %v898_v0  ;;  %689 = vmatprep.subr.bf16.mxu1 %v898_v0 }
  0x7c   :  { %646 = vmatmul.mubr.bf16.vlgmr.msra.gmra.mrb[0].mxu0 %v97_v15  ;;  %666 = vmatmul.mubr.bf16.vlgmr.msra.gmra.mrb[0].mxu1 %v97_v15 }
  0x7d   :  { %670 = vmatpush3.bf16.msra.mxu0 %v728_v16  ;;  %685 = vmatprep.mubr.msk.bf16.mxu0 %vm899_vm0, %v898_v0 }
  0x7e   :  { %671 = vmatprep.subr.bf16.mxu0 %v898_v0  ;;  %705 = vmatprep.mubr.msk.bf16.mxu1 %vm899_vm0, %v898_v0 }
  0x7f   :  { %690 = vmatpush3.bf16.msra.mxu1 %v743_v26 }
  0x80   :  { %691 = vmatprep.subr.bf16.mxu1 %v898_v0 }
  0x81   :  { %672 = vmatpush3.bf16.msra.mxu0 %v730_v18 }
  0x82   :  { %673 = vmatprep.subr.bf16.mxu0 %v898_v0 }
  0x83   :  { %692 = vmatpush3.bf16.msra.mxu1 %v744_v27 }
  0x84   :  { %693 = vmatprep.subr.bf16.mxu1 %v898_v0 }
  0x85   :  { %674 = vmatpush3.bf16.msra.mxu0 %v732_v19 }
  0x86   :  { %675 = vmatprep.subr.bf16.mxu0 %v898_v0 }
  0x87   :  { %694 = vmatpush3.bf16.msra.mxu1 %v745_v28 }
  0x88   :  { %695 = vmatprep.subr.bf16.mxu1 %v898_v0 }
  0x89   :  { %676 = vmatpush3.bf16.msra.mxu0 %v734_v20 }
  0x8a   :  { %677 = vmatprep.subr.bf16.mxu0 %v898_v0 }
  0x8b   :  { %696 = vmatpush3.bf16.msra.mxu1 %v746_v29 }
  0x8c   :  { %697 = vmatprep.subr.bf16.mxu1 %v898_v0 }
  0x8d   :  { %678 = vmatpush3.bf16.msra.mxu0 %v736_v21 }
  0x8e   :  { %679 = vmatprep.subr.bf16.mxu0 %v898_v0 }
  0x8f   :  { %698 = vmatpush3.bf16.msra.mxu1 %v747_v30 }
  0x90   :  { %699 = vmatprep.subr.bf16.mxu1 %v898_v0 }
  0x91   :  { %680 = vmatpush3.bf16.msra.mxu0 %v738_v22 }
  0x92   :  { %681 = vmatprep.subr.bf16.mxu0 %v898_v0 }
  0x93   :  { %700 = vmatpush3.bf16.msra.mxu1 %v748_v31 }
  0x94   :  { %701 = vmatprep.subr.bf16.mxu1 %v898_v0 }
  0x95   :  { %682 = vmatpush3.bf16.msra.mxu0 %v740_v23 }
  0x96   :  { %683 = vmatprep.subr.bf16.mxu0 %v898_v0 }
  0x97   :  { %702 = vmatpush3.bf16.msra.mxu1 %v749_v44 }
  0x98   :  { %703 = vmatprep.subr.bf16.mxu1 %v898_v0 }
  0x99   :  { %684 = vmatpush3.bf16.msra.mxu0 %v742_v25 }
  0x9b   :  { %704 = vmatpush3.bf16.msra.mxu1 %v750_v45 }
 0x14f   :  { %v203_v33 = vpop.f32.mrb[0].mxu0  ;;  %v325_v40 = vpop.f32.mrb[0].mxu1 }
 0x150   :  { %v204_v34 = vadd.f32 %v558_v32, %v203_v33  ;;  %v647_v35 = vpop.f32.mrb[1].mxu0  ;;  %v667_v41 = vpop.f32.mrb[1].mxu1 }
 0x151   :  { %v206_v36 = vpop.f32.mrb[2].mxu0  ;;  %v328_v42 = vpop.f32.mrb[2].mxu1 }
 0x152   :  { %v209_v37 = vmax.f32 %v204_v34, 0.0  ;;  %v648_v38 = vpop.f32.mrb[3].mxu0  ;;  %v668_v43 = vpop.f32.mrb[3].mxu1 }
 0x154   :  { %v210_v39 = vpack.c.bf16 %v209_v37, %v209_v37 }
 0x156   :  { %686 = vmatmul.mubr.bf16.vlgmr.msra.gmra.mrb[4].mxu0 %v210_v39 }
 0x229   :  { %v413_v46 = vpop.f32.mrb[4].mxu0 }
 0x22a   :  { %v414_v48 = vadd.f32 %v413_v46, %v325_v40  ;;  %v687_v49 = vpop.f32.mrb[5].mxu0 }
 0x22b   :  { %v416_v50 = vpop.f32.mrb[6].mxu0 }
 0x22c   :  { %v426_v51 = vadd.f32 %v583_v47, %v414_v48  ;;  %v688_v52 = vpop.f32.mrb[7].mxu0 }
 0x22e   :  { %v427_v53 = vmax.f32 %v426_v51, 0.0 }
 0x230   :  { %v428_v54 = vpack.c.bf16 %v427_v53, %v427_v53 }
 0x232   :  { %706 = vmatmul.mubr.bf16.vlgmr.msra.gmra.mrb[4].mxu1 %v428_v54 }
 0x305   :  { %v534_v56 = vpop.f32.mrb[4].mxu1 }
 0x306   :  { %v535_v57 = vadd.f32 %v584_v55, %v534_v56  ;;  %v707_v58 = vpop.f32.mrb[5].mxu1 }
 0x307   :  { %v537_v59 = vpop.f32.mrb[6].mxu1 }
 0x308   :  { %540 = vst [vmem:[#allocation11] sm:$0x3] %v535_v57  ;;  %v708_v60 = vpop.f32.mrb[7].mxu1 }
 0x309   :  { %872 = shalt.err (!%p869_p2)
}
 0x30a   :  { %s873_s7 = scalar_lea.hbm %s1087_s8, 32 }
 0x30b   :  { %p874_p3 = scmp.ne.s32.totalorder %s1087_s8, %s873_s7  ;;  %p877_p4 = scmp.lt.u32.totalorder %s873_s7, %s1087_s8 }
 0x30d   :  { %p879_p5 = pnand %p877_p4, %p874_p3 }
 0x30f   :  { %882 = shalt.err (!%p879_p5)
}
 0x310   :  { %550 = dma.vmem_to_hbm [thread:$0]  %s548_s26, 32, %s1087_s8, [#allocation4]  }
 0x311   :  { %889 = dma.done.wait [#allocation4], 32  }
 0x312   :  { %890 = vsyncadd [#allocation4], 4294967264 }
 0x313   :  { %554 = vsyncpa [#allocation3], 1 }
 0x314   :  { %555 = vsyncpa [#allocation6], 1 }
 0x315   :  { %556 = vsyncpa [#allocation9], 1 }
 0x316   :  { %557 = vsyncpa [#allocation4], 1 }

</bundles_post_ra>
